<compile_context>
chip_gen: v6e
topology: v6e:2x2x1
jax: 0.10.0
libtpu: 0.0.40
codegen_flags: <defaults>
</compile_context>

<pallas_src>
import functools

import jax
import jax.numpy as jnp
from jax.experimental import pallas as pl
from jax.experimental.pallas import tpu as pltpu


def _groupnorm_kernel(x_ref, w_ref, b_ref, o_ref, *, group_len, eps):
    # x_ref / o_ref: (1, BG, cpg, S)    w_ref / b_ref: (BG, cpg, 1)
    x = x_ref[...].astype(jnp.float32)

    # Group mean over (cpg, S): lane reduce then sublane reduce.
    row_sum = jnp.sum(x, axis=-1, keepdims=True)                     # (1, BG, cpg, 1)
    mean = jnp.sum(row_sum, axis=-2, keepdims=True) * (1.0 / group_len)  # (1, BG, 1, 1)
    diff = x - mean

    # torch.var default is unbiased (divide by L - 1); two-pass like torch.
    sq_sum = jnp.sum(diff * diff, axis=-1, keepdims=True)            # (1, BG, cpg, 1)
    var = jnp.sum(sq_sum, axis=-2, keepdims=True) * (1.0 / (group_len - 1))

    # Hoisted: ONE reciprocal per group (shape (1, BG, 1, 1)), not per element;
    # the per-element work is then a single VALU multiply + the EUP sqrt.
    inv = 1.0 / (var + eps)

    # NOTE: reference module applies sqrt to the WHOLE normalized value
    # (produces NaN for negative (x - mean)); reproduced exactly.
    y = jnp.sqrt(diff * inv)

    # Affine: compact (BG, cpg, 1) params broadcast over the spatial (lane) axis.
    y = y * w_ref[...][None] + b_ref[...][None]
    o_ref[...] = y.astype(o_ref.dtype)


def group_norm(x, weight, bias, channels_per_group=8, eps=0.01):
    """Pallas GroupNorm matching the PyTorch module's forward semantics."""
    N, C = x.shape[0], x.shape[1]
    spatial = 1
    for d in x.shape[2:]:
        spatial *= d
    if C <= channels_per_group:
        G = 1
    else:
        assert C % channels_per_group == 0
        G = C // channels_per_group
    cpg = C // G
    L = cpg * spatial

    # Free contiguous view: (N, G, cpg, spatial).  cpg sits on the sublane axis,
    # spatial on the lane axis.
    x_r = x.reshape(N, G, cpg, spatial)

    # Compact per-channel affine params; no pre-broadcast slabs.
    w_r = weight.astype(jnp.float32).reshape(G, cpg, 1)
    b_r = bias.astype(jnp.float32).reshape(G, cpg, 1)

    # Group-tiling knob: keep double-buffered (in + out) blocks under ~24 MiB so
    # the kernel fits on every generation (v7x has only 64 MiB physical VMEM).
    block_budget = 24 * 1024 * 1024
    bytes_per_group = cpg * spatial * x.dtype.itemsize
    max_bg = max(1, block_budget // (4 * bytes_per_group))  # 2 bufs x (in + out)
    BG = int(min(G, max_bg))
    while G % BG:
        BG -= 1
    # TODO(synk): if a single group (cpg * spatial) ever exceeds the block
    # budget, the reduction length would need to be split across grid steps
    # (two-pass or running-sum accumulation); not needed for these shapes.

    kernel = functools.partial(_groupnorm_kernel, group_len=L, eps=eps)
    out = pl.pallas_call(
        kernel,
        out_shape=jax.ShapeDtypeStruct((N, G, cpg, spatial), x.dtype),
        grid_spec=pltpu.PrefetchScalarGridSpec(
            num_scalar_prefetch=0,
            grid=(N, G // BG),
            in_specs=[
                # per-sample, per-group-tile block
                pl.BlockSpec((1, BG, cpg, spatial), lambda n, g: (n, g, 0, 0)),
                # compact affine params (last two dims are full array dims)
                pl.BlockSpec((BG, cpg, 1), lambda n, g: (g, 0, 0)),
                pl.BlockSpec((BG, cpg, 1), lambda n, g: (g, 0, 0)),
            ],
            out_specs=pl.BlockSpec((1, BG, cpg, spatial), lambda n, g: (n, g, 0, 0)),
        ),
        compiler_params=pltpu.CompilerParams(
            # Two independent axes -> both TCs get work on v7x even for small N.
            dimension_semantics=("parallel", "parallel"),
            # Headroom over the default scoped limit (16/32/32 MiB) while
            # staying well under v7x's 64 MiB physical VMEM.
            vmem_limit_bytes=48 * 1024 * 1024,
        ),
    )(x_r, w_r, b_r)
    return out.reshape(x.shape)


if __name__ == "__main__":
    key = jax.random.PRNGKey(0)
    k1, k2, k3 = jax.random.split(key, 3)

    N, C, H, W = 2, 16, 16, 16
    channels_per_group = 8
    eps = 0.01

    x = jax.random.normal(k1, (N, C, H, W), dtype=jnp.float32)
    # Deterministic synthetic parameters (module default is ones/zeros; use
    # non-trivial values so the affine path is exercised).
    weight = 1.0 + 0.1 * jax.random.normal(k2, (C,), dtype=jnp.float32)
    bias = 0.1 * jax.random.normal(k3, (C,), dtype=jnp.float32)

    out = group_norm(x, weight, bias, channels_per_group=channels_per_group, eps=eps)
    out = jax.block_until_ready(out)

    # Pure-JAX reference reproducing the PyTorch forward exactly.
    G = C // channels_per_group
    xr = x.reshape(N, G, -1).astype(jnp.float32)
    mean = xr.mean(-1, keepdims=True)
    var = xr.var(-1, keepdims=True, ddof=1)  # torch.var is unbiased
    ref = jnp.sqrt((xr - mean) / (var + eps)).reshape(N, C, H, W)
    ref = ref * weight.reshape(1, C, 1, 1) + bias.reshape(1, C, 1, 1)

    assert jnp.allclose(out, ref, atol=1e-5, rtol=1e-5, equal_nan=True), (
        "Pallas GroupNorm mismatch vs reference"
    )
    print("KERNEL_OK")
</pallas_src>

<mosaic_0001>
module attributes {stable_mosaic.version = 11 : i64} {
  func.func @_groupnorm_kernel(%arg0: i32, %arg1: i32, %arg2: memref<1x2x8x256xf32, #tpu.memory_space<vmem>>, %arg3: memref<2x8x1xf32, #tpu.memory_space<vmem>>, %arg4: memref<2x8x1xf32, #tpu.memory_space<vmem>>, %arg5: memref<1x2x8x256xf32, #tpu.memory_space<vmem>>) attributes {dimension_semantics = [#tpu.dimension_semantics<parallel>, #tpu.dimension_semantics<parallel>], iteration_bounds = array<i64: 2, 1>, scalar_prefetch = 0 : i64, scratch_operands = 0 : i64, tpu.core_type = #tpu.core_type<tc>, window_params = [{transform_indices = @transform_0, window_bounds = array<i64: 1, 2, 8, 256>}, {transform_indices = @transform_1, window_bounds = array<i64: 2, 8, 1>}, {transform_indices = @transform_2, window_bounds = array<i64: 2, 8, 1>}, {transform_indices = @transform_3, window_bounds = array<i64: 1, 2, 8, 256>}]} {
    %c0 = arith.constant 0 : index
    %c0_0 = arith.constant 0 : index
    %c0_1 = arith.constant 0 : index
    %c0_2 = arith.constant 0 : index
    %0 = vector.load %arg2[%c0, %c0_0, %c0_1, %c0_2] : memref<1x2x8x256xf32, #tpu.memory_space<vmem>>, vector<1x2x8x256xf32>
    %cst = arith.constant dense<0.000000e+00> : vector<1x2x8xf32>
    %1 = vector.multi_reduction <add>, %0, %cst [3] : vector<1x2x8x256xf32> to vector<1x2x8xf32>
    %2 = vector.shape_cast %1 : vector<1x2x8xf32> to vector<1x2x8x1xf32>
    %cst_3 = arith.constant dense<0.000000e+00> : vector<1x2x1xf32>
    %3 = vector.multi_reduction <add>, %2, %cst_3 [2] : vector<1x2x8x1xf32> to vector<1x2x1xf32>
    %4 = vector.shape_cast %3 : vector<1x2x1xf32> to vector<1x2x1x1xf32>
    %cst_4 = arith.constant 4.8828125E-4 : f32
    %5 = vector.broadcast %cst_4 : f32 to vector<1x2x1x1xf32>
    %6 = arith.mulf %4, %5 : vector<1x2x1x1xf32>
    %7 = vector.broadcast %6 : vector<1x2x1x1xf32> to vector<1x2x8x256xf32>
    %8 = arith.subf %0, %7 : vector<1x2x8x256xf32>
    %9 = arith.mulf %8, %8 : vector<1x2x8x256xf32>
    %cst_5 = arith.constant dense<0.000000e+00> : vector<1x2x8xf32>
    %10 = vector.multi_reduction <add>, %9, %cst_5 [3] : vector<1x2x8x256xf32> to vector<1x2x8xf32>
    %11 = vector.shape_cast %10 : vector<1x2x8xf32> to vector<1x2x8x1xf32>
    %cst_6 = arith.constant dense<0.000000e+00> : vector<1x2x1xf32>
    %12 = vector.multi_reduction <add>, %11, %cst_6 [2] : vector<1x2x8x1xf32> to vector<1x2x1xf32>
    %13 = vector.shape_cast %12 : vector<1x2x1xf32> to vector<1x2x1x1xf32>
    %cst_7 = arith.constant 4.88519785E-4 : f32
    %14 = vector.broadcast %cst_7 : f32 to vector<1x2x1x1xf32>
    %15 = arith.mulf %13, %14 : vector<1x2x1x1xf32>
    %cst_8 = arith.constant 0.00999999977 : f32
    %16 = vector.broadcast %cst_8 : f32 to vector<1x2x1x1xf32>
    %17 = arith.addf %15, %16 : vector<1x2x1x1xf32>
    %cst_9 = arith.constant 1.000000e+00 : f32
    %18 = vector.broadcast %cst_9 : f32 to vector<1x2x1x1xf32>
    %19 = arith.divf %18, %17 : vector<1x2x1x1xf32>
    %20 = vector.broadcast %19 : vector<1x2x1x1xf32> to vector<1x2x8x256xf32>
    %21 = arith.mulf %8, %20 : vector<1x2x8x256xf32>
    %22 = math.sqrt %21 : vector<1x2x8x256xf32>
    %c0_10 = arith.constant 0 : index
    %c0_11 = arith.constant 0 : index
    %c0_12 = arith.constant 0 : index
    %23 = vector.load %arg3[%c0_10, %c0_11, %c0_12] : memref<2x8x1xf32, #tpu.memory_space<vmem>>, vector<2x8x1xf32>
    %24 = vector.shape_cast %23 : vector<2x8x1xf32> to vector<1x2x8x1xf32>
    %25 = vector.broadcast %24 : vector<1x2x8x1xf32> to vector<1x2x8x256xf32>
    %26 = arith.mulf %22, %25 : vector<1x2x8x256xf32>
    %c0_13 = arith.constant 0 : index
    %c0_14 = arith.constant 0 : index
    %c0_15 = arith.constant 0 : index
    %27 = vector.load %arg4[%c0_13, %c0_14, %c0_15] : memref<2x8x1xf32, #tpu.memory_space<vmem>>, vector<2x8x1xf32>
    %28 = vector.shape_cast %27 : vector<2x8x1xf32> to vector<1x2x8x1xf32>
    %29 = vector.broadcast %28 : vector<1x2x8x1xf32> to vector<1x2x8x256xf32>
    %30 = arith.addf %26, %29 : vector<1x2x8x256xf32>
    %c0_16 = arith.constant 0 : index
    %c0_17 = arith.constant 0 : index
    %c0_18 = arith.constant 0 : index
    %c0_19 = arith.constant 0 : index
    %31 = vector.load %arg5[%c0_16, %c0_17, %c0_18, %c0_19] : memref<1x2x8x256xf32, #tpu.memory_space<vmem>>, vector<1x2x8x256xf32>
    tpu.vector_store %arg5[%c0_16, %c0_17, %c0_18, %c0_19], %30 {strides = array<i32>} : memref<1x2x8x256xf32, #tpu.memory_space<vmem>>, vector<1x2x8x256xf32>,
    return
  }
  func.func @transform_0(%arg0: i32, %arg1: i32) -> (i32, i32, i32, i32) {
    %c0_i32 = arith.constant 0 : i32
    %c0_i32_0 = arith.constant 0 : i32
    %c0_i32_1 = arith.constant 0 : i32
    return %arg0, %arg1, %c0_i32, %c0_i32_0 : i32, i32, i32, i32
  }
  func.func @transform_1(%arg0: i32, %arg1: i32) -> (i32, i32, i32) {
    %c0_i32 = arith.constant 0 : i32
    %c0_i32_0 = arith.constant 0 : i32
    %c0_i32_1 = arith.constant 0 : i32
    return %arg1, %c0_i32, %c0_i32_0 : i32, i32, i32
  }
  func.func @transform_2(%arg0: i32, %arg1: i32) -> (i32, i32, i32) {
    %c0_i32 = arith.constant 0 : i32
    %c0_i32_0 = arith.constant 0 : i32
    %c0_i32_1 = arith.constant 0 : i32
    return %arg1, %c0_i32, %c0_i32_0 : i32, i32, i32
  }
  func.func @transform_3(%arg0: i32, %arg1: i32) -> (i32, i32, i32, i32) {
    %c0_i32 = arith.constant 0 : i32
    %c0_i32_0 = arith.constant 0 : i32
    %c0_i32_1 = arith.constant 0 : i32
    return %arg0, %arg1, %c0_i32, %c0_i32_0 : i32, i32, i32, i32
  }
}

</mosaic_0001>

<bundles_post_ra>
// kernel: tpu_custom_call.1
= control target key start
LH: loop header
LB: loop body
LE: loop exit
PB: predicated region body
PF: predicated region fallthrough
CT: control target
= control target key end

     0   :  { %8 = vsyncpa [#allocation3], 0  ;;  %s913_s0 = inlined_call_operand.hbm [shape: f32[2,2,8,256], index: 0, kind: input, shape index: {}]   ;;  %s914_s1 = inlined_call_operand.vmem [shape: f32[2,8,1], index: 1, kind: input, shape index: {}]   ;;  %s915_s2 = inlined_call_operand.vmem [shape: f32[2,8,1], index: 2, kind: input, shape index: {}]   ;;  %s916_s3 = inlined_call_operand.hbm [shape: f32[2,2,8,256], index: 3, kind: output, shape index: {}]  }
   0x1   :  { %10 = vsyncpa [#allocation3 + $0x1], 0 }
   0x2   :  { %11 = vsyncpa [#allocation4], 0 }
   0x3   :  { %13 = vsyncpa [#allocation4 + $0x1], 0  ;;  %s751_s12 = smov 0   ;;  %s753_s13 = smov 0  }
   0x4   :  { %s755_s14 = smov 0   ;;  %s757_s15 = smov 0  }
   0x5   :  { %s759_s16 = smov 0   ;;  %s761_s17 = smov 0  }
   0x6 LB: > { %s514_s18 = sadd.s32 4294967295, %s722_s17   ;;  %s515_s19 = sadd.s32 4294967294, %s722_s17   ;;  %s722_s17 = sphi %s761_s17, %s19_s17   ;;  %s718_s16 = sphi %s759_s16, %s927_s16   ;;  %s714_s15 = sphi %s757_s15, %s926_s15   ;;  %s710_s14 = sphi %s755_s14, %s925_s14   ;;  %s706_s13 = sphi %s753_s13, %s924_s13   ;;  %s702_s12 = sphi %s751_s12, %s923_s12  }
   0x7   : > { %s31_s20 = sadd.s32 1, %s718_s16  ;;  %s40_s21 = sadd.s32 1, %s710_s14 }
   0x8   : > { %p33_p0 = scmp.ge.s32.totalorder %s31_s20, 2  ;;  %p47_p1 = scmp.ne.s32.totalorder %s710_s14, %s706_s13 }
   0x9   : > { %p48_p2 = scmp.eq.s32.totalorder %s722_s17, 0  ;;  %p53_p3 = scmp.ne.s32.totalorder %s706_s13, %s702_s12 }
   0xa   : > { %s929_s20 = smov (%p33_p0, %s31_s20), 0  ;;  %p54_p5 = scmp.eq.s32.totalorder %s514_s18, 0 }
   0xb   : > { %p792_p4 = por %p48_p2, %p47_p1  ;;  %s35_s23 = ssub.s32 %s718_s16, %s929_s20 }
   0xc   : > { %p131_p6 = scmp.eq.s32.totalorder %s514_s18, 1  ;;  %p38_p7 = scmp.eq.s32.totalorder %s35_s23, 0 }
   0xd   : > { %p798_p8 = por %p54_p5, %p53_p3  ;;  %p137_p10 = scmp.eq.s32.totalorder %s515_s19, 1 }
   0xe   : > { %p802_p9 = por %p131_p6, %p47_p1  ;;  %p545_p13 = scmp.lt.s32.totalorder %s722_s17, 2 }
   0xf   : > { %s807_s26 = scalar_select %p38_p7, %s710_s14, %s40_s21  }
  0x10   : > { %p809_p11 = por %p137_p10, %p53_p3  ;;  %s175_s28 = sand.u32 1, %s710_s14  }
  0x11   : > { %s520_s29 = sshll.u32 %s175_s28, 5  ;;  %s531_s30 = sshll.u32 %s718_s16, 9 }
  0x12   : > { %s188_s6 = scalar_lea.hbm %s913_s0, %s531_s30  ;;  %s179_s7 = scalar_lea.vmem [#allocation2], %s520_s29 }
  0x13   : > { %s189_s8 = sshll.u32 %s179_s7, 4  ;;  %p822_p0 = pnand %p545_p13, %p792_p4  ;;  %s190_s8 = int_to_ptr.vmem [resolvable:$true] %s189_s8 }
  0x14   : > { %p523_p1 = scmp.ge.s32.totalorder %s722_s17, 1  ;;  %s176_s10 = scalar_lea.sflag [#allocation3], %s175_s28 }
  0x15   : > { %p616_p2 = pneg %p822_p0  ;;  %s627_s11 = scalar_lea.vmem %s190_s8, 512 }
  0x16   : > { %p628_p3 = scmp.ne.s32.totalorder %s190_s8, %s627_s11  ;;  %s724_s18 = smov [#allocation2]  }
  0x17   : > { %s632_s19 = sshll.u32 %s724_s18, 4  ;;  %s633_s19 = int_to_ptr.vmem [resolvable:$false] %s632_s19 }
  0x18   : > { %p630_p5 = pnand %p628_p3, %p616_p2  ;;  %s634_s21 = scalar_lea.vmem %s633_s19, 1024 }
  0x19   : > { %p635_p7 = scmp.lt.s32.totalorder %s190_s8, %s633_s19  ;;  %p636_p10 = scmp.lt.s32.totalorder %s634_s21, %s627_s11 }
  0x1a   : > { %p631_p6 = pneg %p630_p5 }
  0x1b   : > { %p637_p12 = por %p636_p10, %p635_p7 }
  0x1d   : > { %p638_p4 = pnand %p637_p12, %p631_p6 }
  0x1f   : > { %641 = shalt.err (!%p638_p4)
}
  0x20   : > { %s725_s22 = smov 256   ;;  %s726_s23 = smov 16  }
  0x21   : > { %540 = dma.hbm_to_vmem [thread:$0]  (!%p822_p0), %s188_s6, 512, %s190_s8, %s176_s10, %s725_s22, %s725_s22, %s726_s23  }
  0x22   : > { %p197_p13 = scmp.lt.s32.totalorder %s722_s17, 3 }
  0x24   : > { %p198_p2 = pnand %p523_p1, %p197_p13 }
  0x25   : > { %s835_s28 = sand.u32 (!%p198_p2), 1, %s706_s13  }
  0x26   : > { %201 = sbr.rel (%p198_p2) target bundleno = 416 (0x1a0), region = 32  ;;  %s524_s29 = sshll.u32 (!%p198_p2), %s835_s28, 5 }
  0x27   : > { %s204_s30 = scalar_lea.sflag (!%p198_p2), [#allocation3], %s835_s28  ;;  %s207_s4 = scalar_lea.vmem (!%p198_p2), [#allocation2], %s524_s29 }
  0x2b   : > { %693 = dma.done.wait (%p798_p8), %s204_s30, 512  }
  0x2c   : > { %695 = vsyncadd (%p798_p8), %s204_s30, 4294966784  ;;  %v254_v0 = vld [vmem:[%s207_s4] sm:$0xff]  ;;  %v255_v1 = vld [vmem:[%s207_s4 + $0x8] sm:$0xff]  ;;  %v727_v6 = vmov 0   ;;  %s239_s18 = scalar_lea.vmem [#allocation5], %s524_s29  ;;  %s532_s21 = sshll.u32 %s714_s15, 9 }
  0x2d   : > { %v256_v2 = vld [vmem:[%s207_s4 + $0x10] sm:$0xff]  ;;  %v258_v3 = vadd.f32 %v255_v1, %v254_v0  ;;  %v257_v4 = vld [vmem:[%s207_s4 + $0x18] sm:$0xff]  ;;  %601 = vset.pattern.permute.xlu1 %v727_v6  ;;  %600 = vset.pattern.permute.xlu0 %v727_v6  ;;  %v344_v7 = vld [vmem:[%s914_s1] sm:$0xff]  ;;  %s397_s19 = sshll.u32 %s239_s18, 4  ;;  %s865_s29 = scalar_lea.hbm %s916_s3, %s532_s21  ;;  %s860_s19 = int_to_ptr.vmem [resolvable:$true] %s397_s19 }
  0x2e   : > { %v261_v5 = vadd.f32 %v257_v4, %v256_v2  ;;  %v345_v34 = vld [vmem:[%s914_s1 + $0x8] sm:$0xff]  ;;  %v360_v35 = vld [vmem:[%s915_s2] sm:$0xff]  ;;  %s381_s15 = scalar_lea.sflag [#allocation4], %s835_s28  ;;  %s642_s30 = scalar_lea.vmem %s860_s19, 512 }
  0x2f   : > { %259 = vadd.xlane.f32.xlu0 %v258_v3  ;;  %v361_v36 = vld [vmem:[%s915_s2 + $0x8] sm:$0xff]  ;;  %p643_p8 = scmp.ne.s32.totalorder %s860_s19, %s642_s30  ;;  %s728_s4 = smov [#allocation5]  }
  0x30   : > { %s646_s5 = sshll.u32 %s728_s4, 4  ;;  %s647_s5 = int_to_ptr.vmem [resolvable:$false] %s646_s5 }
  0x31   : > { %p644_p12 = pnand %p643_p8, %p802_p9  ;;  %s648_s6 = scalar_lea.vmem %s647_s5, 1024 }
  0x32   : > { %p649_p1 = scmp.lt.s32.totalorder %s860_s19, %s647_s5  ;;  %p650_p3 = scmp.lt.s32.totalorder %s648_s6, %s642_s30 }
  0x33   : > { %262 = vadd.xlane.f32.xlu0 %v261_v5  ;;  %p645_p0 = pneg %p644_p12 }
  0x34   : > { %p651_p5 = por %p650_p3, %p649_p1 }
  0x36   : > { %p652_p6 = pnand %p651_p5, %p645_p0 }
  0x49   : > { %348 = vperm.xlu0 %600, %v344_v7  }
  0xb8   : > { %v260_v8 = vpop.xlane.xlu0 %259 }
  0xb9   : > { %v264_v9 = vrot.slane %v260_v8, 4 }
  0xbb   : > { %v265_v10 = vadd.f32 %v264_v9, %v260_v8 }
  0xbc   : > { %v263_v11 = vpop.xlane.xlu0 %262 }
  0xbd   : > { %v266_v12 = vrot.slane %v265_v10, 2  ;;  %v270_v13 = vrot.slane %v263_v11, 4 }
  0xbf   : > { %v267_v14 = vadd.f32 %v266_v12, %v265_v10  ;;  %v271_v15 = vadd.f32 %v270_v13, %v263_v11 }
  0xc1   : > { %v268_v16 = vrot.slane %v267_v14, 1  ;;  %v272_v17 = vrot.slane %v271_v15, 2 }
  0xc3   : > { %v269_v18 = vadd.f32 %v268_v16, %v267_v14  ;;  %v273_v19 = vadd.f32 %v272_v17, %v271_v15 }
  0xc4   : > { %v349_v3 = vpop.permute.xlu0 %348 }
  0xc5   : > { %v274_v20 = vrot.slane %v273_v19, 1  ;;  %v276_v21 = vmul.f32 0.00048828125, %v269_v18 }
  0xc7   : > { %v275_v22 = vadd.f32 %v274_v20, %v273_v19  ;;  %v278_v23 = vsub.f32 %v254_v0, %v276_v21  ;;  %v279_v24 = vsub.f32 %v255_v1, %v276_v21 }
  0xc9   : > { %v277_v25 = vmul.f32 0.00048828125, %v275_v22  ;;  %v282_v26 = vmul.f32 %v278_v23, %v278_v23  ;;  %v283_v27 = vmul.f32 %v279_v24, %v279_v24 }
  0xcb   : > { %v286_v28 = vadd.f32 %v283_v27, %v282_v26  ;;  %v280_v29 = vsub.f32 %v256_v2, %v277_v25  ;;  %v281_v30 = vsub.f32 %v257_v4, %v277_v25 }
  0xcd   : > { %287 = vadd.xlane.f32.xlu1 %v286_v28  ;;  %v284_v31 = vmul.f32 %v280_v29, %v280_v29  ;;  %v285_v32 = vmul.f32 %v281_v30, %v281_v30 }
  0xcf   : > { %v289_v33 = vadd.f32 %v285_v32, %v284_v31 }
  0xd1   : > { %290 = vadd.xlane.f32.xlu1 %v289_v33 }
  0xe2   : > { %353 = vperm.xlu1 %601, %v345_v34  }
  0xe6   : > { %364 = vperm.xlu1 %601, %v360_v35  }
  0xea   : > { %369 = vperm.xlu1 %601, %v361_v36  }
 0x156   : > { %v288_v37 = vpop.xlane.xlu1 %287 }
 0x157   : > { %v292_v38 = vrot.slane %v288_v37, 4 }
 0x159   : > { %v293_v39 = vadd.f32 %v292_v38, %v288_v37 }
 0x15a   : > { %v291_v40 = vpop.xlane.xlu1 %290 }
 0x15b   : > { %v294_v41 = vrot.slane %v293_v39, 2  ;;  %v298_v42 = vrot.slane %v291_v40, 4 }
 0x15d   : > { %v295_v43 = vadd.f32 %v294_v41, %v293_v39  ;;  %v299_v44 = vadd.f32 %v298_v42, %v291_v40 }
 0x15e   : > { %v354_v61 = vpop.permute.xlu1 %353 }
 0x15f   : > { %v296_v45 = vrot.slane %v295_v43, 1  ;;  %v300_v46 = vrot.slane %v299_v44, 2 }
 0x161   : > { %v297_v47 = vadd.f32 %v296_v45, %v295_v43  ;;  %v301_v48 = vadd.f32 %v300_v46, %v299_v44 }
 0x162   : > { %v365_v7 = vpop.permute.xlu1 %364 }
 0x163   : > { %v304_v49 = vmul.f32 0.0004885198, %v297_v47  ;;  %v302_v50 = vrot.slane %v301_v48, 1 }
 0x165   : > { %v306_v51 = vadd.f32 0.01, %v304_v49  ;;  %v303_v52 = vadd.f32 %v302_v50, %v301_v48 }
 0x166   : > { %v370_v26 = vpop.permute.xlu1 %369 }
 0x167   : > { %602 = vrcp.f32 %v306_v51  ;;  %v305_v53 = vmul.f32 0.0004885198, %v303_v52 }
 0x169   : > { %v307_v54 = vadd.f32 0.01, %v305_v53 }
 0x16b   : > { %604 = vrcp.f32 %v307_v54 }
 0x174   : > { %v603_v55 = vpop.eup %602 }
 0x175   : > { %v312_v56 = vmul.f32 %v603_v55, %v278_v23  ;;  %v313_v57 = vmul.f32 %v603_v55, %v279_v24 }
 0x177   : > { %606 = vrsqrt.f32 %v312_v56  ;;  %vm318_vm0 = vcmp.eq.f32.partialorder %v312_v56, inf  ;;  %v321_v1 = vand.u32 2147483648, %v312_v56  ;;  %vm320_vm1 = vcmp.eq.f32.partialorder %v312_v56, 0.0 }
 0x178   : > { %v605_v58 = vpop.eup %604  ;;  %608 = vrsqrt.f32 %v313_v57  ;;  %vm325_vm2 = vcmp.eq.f32.partialorder %v313_v57, inf  ;;  %v328_v5 = vand.u32 2147483648, %v313_v57  ;;  %vm327_vm3 = vcmp.eq.f32.partialorder %v313_v57, 0.0 }
 0x179   : > { %v314_v59 = vmul.f32 %v605_v58, %v280_v29  ;;  %v315_v60 = vmul.f32 %v605_v58, %v281_v30 }
 0x17b   : > { %610 = vrsqrt.f32 %v314_v59  ;;  %vm332_vm4 = vcmp.eq.f32.partialorder %v314_v59, inf  ;;  %vm334_vm5 = vcmp.eq.f32.partialorder %v314_v59, 0.0  ;;  %v335_v14 = vand.u32 2147483648, %v314_v59 }
 0x17c   : > { %612 = vrsqrt.f32 %v315_v60  ;;  %vm339_vm6 = vcmp.eq.f32.partialorder %v315_v60, inf  ;;  %v342_v18 = vand.u32 2147483648, %v315_v60  ;;  %vm341_vm7 = vcmp.eq.f32.partialorder %v315_v60, 0.0 }
 0x184   : > { %v607_v62 = vpop.eup %606 }
 0x185   : > { %v609_v63 = vpop.eup %608  ;;  %v317_v0 = vmul.f32 %v607_v62, %v312_v56 }
 0x186   : > { %v324_v2 = vmul.f32 %v609_v63, %v313_v57 }
 0x187   : > { %v319_v4 = vsel %vm318_vm0, %v312_v56, %v317_v0 }
 0x188   : > { %v611_v6 = vpop.eup %610  ;;  %v322_v8 = vsel %vm320_vm1, %v321_v1, %v319_v4  ;;  %v326_v9 = vsel %vm325_vm2, %v313_v57, %v324_v2 }
 0x189   : > { %v613_v10 = vpop.eup %612  ;;  %v331_v11 = vmul.f32 %v611_v6, %v314_v59  ;;  %v329_v12 = vsel %vm327_vm3, %v328_v5, %v326_v9  ;;  %v356_v13 = vmul.f32 %v349_v3, %v322_v8 }
 0x18a   : > { %v338_v15 = vmul.f32 %v613_v10, %v315_v60  ;;  %v357_v16 = vmul.f32 %v349_v3, %v329_v12 }
 0x18b   : > { %v333_v17 = vsel %vm332_vm4, %v314_v59, %v331_v11  ;;  %v372_v19 = vadd.f32 %v365_v7, %v356_v13 }
 0x18c   : > { %v336_v20 = vsel %vm334_vm5, %v335_v14, %v333_v17  ;;  %v340_v21 = vsel %vm339_vm6, %v315_v60, %v338_v15  ;;  %v373_v22 = vadd.f32 %v365_v7, %v357_v16 }
 0x18d   : > { %v343_v23 = vsel %vm341_vm7, %v342_v18, %v340_v21  ;;  %v358_v24 = vmul.f32 %v354_v61, %v336_v20  ;;  %376 = vst [vmem:[%s239_s18] sm:$0xff] %v372_v19 }
 0x18e   : > { %v359_v25 = vmul.f32 %v354_v61, %v343_v23  ;;  %377 = vst [vmem:[%s239_s18 + $0x8] sm:$0xff] %v373_v22 }
 0x18f   : > { %v374_v27 = vadd.f32 %v370_v26, %v358_v24 }
 0x190   : > { %v375_v28 = vadd.f32 %v370_v26, %v359_v25 }
 0x191   : > { %378 = vst [vmem:[%s239_s18 + $0x10] sm:$0xff] %v374_v27 }
 0x192   : > { %379 = vst [vmem:[%s239_s18 + $0x18] sm:$0xff] %v375_v28 }
 0x193   : > { %655 = shalt.err (!%p652_p6)
}
 0x194   : > { %s656_s24 = scalar_lea.hbm %s865_s29, 512  ;;  %s660_s9 = scalar_lea.hbm %s916_s3, 1024 }
 0x195   : > { %p657_p7 = scmp.ne.s32.totalorder %s865_s29, %s656_s24  ;;  %p661_p13 = scmp.lt.s32.totalorder %s865_s29, %s916_s3 }
 0x196   : > { %p662_p2 = scmp.lt.s32.totalorder %s660_s9, %s656_s24 }
 0x197   : > { %p658_p10 = pnand %p657_p7, %p802_p9 }
 0x198   : > { %p663_p8 = por %p662_p2, %p661_p13 }
 0x199   : > { %p659_p4 = pneg %p658_p10 }
 0x19b   : > { %p664_p12 = pnand %p663_p8, %p659_p4 }
 0x19d   : > { %667 = shalt.err (!%p664_p12)
}
 0x19e   : > { %s729_s18 = smov 256   ;;  %s730_s21 = smov 16  }
 0x19f   : > { %535 = dma.vmem_to_hbm [thread:$0]  (%p802_p9), %s860_s19, 512, %s865_s29, %s381_s15, %s729_s18, %s729_s18, %s730_s21  }
 0x1a0 PF: > { %s412_s22 = sand.u32 1, %s702_s12   ;;  %p922_p0 = scmp.ge.s32.totalorder %s722_s17, 2 }
 0x1a1   : > { %s413_s23 = scalar_lea.sflag [#allocation4], %s412_s22 }
 0x1a2   : > { %p542_p1 = pnand %p922_p0, %p809_p11 }
 0x1a4   : > { %p543_p3 = pneg %p542_p1 }
 0x1a6   : > { %697 = dma.done.wait (%p543_p3), %s413_s23, 512  }
 0x1a7   : > { %699 = vsyncadd (%p543_p3), %s413_s23, 4294966784  ;;  %s19_s17 = sadd.s32 1, %s722_s17   ;;  %s923_s12 = smov %s706_s13 }
 0x1a8   : > { %p16_p5 = scmp.ge.s32.totalorder %s19_s17, 4   ;;  %s924_s13 = smov %s710_s14 }
 0x1a9   : > { %s925_s14 = smov %s807_s26  ;;  %s926_s15 = smov %s718_s16 }
 0x1aa   : > { %s927_s16 = smov %s929_s20  ;;  %18 = sbr.rel (!%p16_p5) target bundleno = 6 (0x6), region = 83 }
 0x1af   :  { %418 = vsyncpa [#allocation3], 1 }
 0x1b0   :  { %420 = vsyncpa [#allocation3 + $0x1], 1 }
 0x1b1   :  { %421 = vsyncpa [#allocation4], 1 }
 0x1b2   :  { %423 = vsyncpa [#allocation4 + $0x1], 1 }

</bundles_post_ra>
